<compile_context>
chip_gen: v7x
topology: tpu7x:2x2x1
jax: 0.10.0
libtpu: 0.0.40
codegen_flags: <defaults>
</compile_context>

<pallas_src>
import jax
import jax.numpy as jnp
import numpy as np
from jax import lax
from jax.experimental import pallas as pl
from jax.experimental.pallas import tpu as pltpu

KERNEL_SIZE = 4            # K
PAD = KERNEL_SIZE // 2     # 2  -> output length T + 1
_LANE = 128
_SUBLANE = 8
_HALO = 8                  # 8-row halo blocks on each side of a time tile


def _round_up(x, m):
    return (x + m - 1) // m * m


def _cdiv(a, b):
    return -(-a // b)


def _make_kernel(t_tile, chunk, d_tile, t_valid, n_chunks):
    """Kernel for a fixed tiling.  t_valid = original T (rows >= T are conv zero-pad)."""
    K = KERNEL_SIZE

    def kernel(xm_ref, xl_ref, xr_ref, w_ref, o_ref, edge_ref):
        # xm_ref: (1, t_tile, d_tile)   x rows [t0, t0+t_tile)  (partial/clamped at end)
        # xl_ref: (1, 8, d_tile)        x rows [t0-8, t0)       (clamped at t == 0)
        # xr_ref: (1, 8, d_tile)        x rows [t0+t_tile, +8)  (clamped at the end)
        # w_ref : (8, d_tile) f32       taps on sublanes 0..3 (rows >= K are zero)
        # o_ref : (1, t_tile, d_tile)   output tile
        # edge_ref: (chunk + 16, d_tile) small scratch for the boundary chunks only
        t = pl.program_id(2)
        t0 = t * t_tile
        out_dtype = o_ref.dtype
        f32 = jnp.float32

        # Per-tap weight rows (f32) and their chunk-height broadcasts, hoisted once per
        # tile (JAX/Mosaic does not CSE broadcast_in_dim).
        w_row = [w_ref[j:j + 1, :] for j in range(K)]
        w_bc = [jnp.broadcast_to(w_row[j], (chunk, d_tile)) for j in range(K)]

        # ---- boundary chunks (first / last chunk of the tile) -------------------
        # Assemble the zero-padded window [lo-8, lo+chunk+8) into the small edge
        # scratch (masks reproduce the conv zero padding and x[t >= T] == 0), then run
        # the same 4-tap MAC against it.  Cost is O(chunk+16) rows per tile only.
        def boundary(lo):                                    # lo is a Python int
            g0 = t0 + lo                                     # global first output row
            left = xl_ref[0] if lo == 0 else xm_ref[0, lo - _HALO:lo, :]
            gl = lax.broadcasted_iota(jnp.int32, (_HALO, 1), 0) + (g0 - _HALO)
            edge_ref[0:_HALO, :] = jnp.where((gl >= 0) & (gl < t_valid), left, 0)

            gm = lax.broadcasted_iota(jnp.int32, (chunk, 1), 0) + g0
            edge_ref[_HALO:_HALO + chunk, :] = jnp.where(
                gm < t_valid, xm_ref[0, lo:lo + chunk, :], 0)

            right = (xr_ref[0] if lo + chunk == t_tile
                     else xm_ref[0, lo + chunk:lo + chunk + _HALO, :])
            gr = lax.broadcasted_iota(jnp.int32, (_HALO, 1), 0) + (g0 + chunk)
            edge_ref[_HALO + chunk:2 * _HALO + chunk, :] = jnp.where(
                gr < t_valid, right, 0)

            off = _HALO - PAD                                # = 6
            acc = edge_ref[off:off + chunk, :].astype(f32) * w_bc[0]
            for j in range(1, K):
                acc = acc + edge_ref[off + j:off + j + chunk, :].astype(f32) * w_bc[j]
            o_ref[0, lo:lo + chunk, :] = acc.astype(out_dtype)

        boundary(0)

        # ---- interior chunks: direct reads from xm, no masks, no scratch ---------
        # out[o] = sum_j w[j] * x[o + j - PAD]; all reads stay inside [0, t_tile).
        for c in range(1, n_chunks - 1):
            base = c * chunk
            acc = xm_ref[0, base - PAD:base - PAD + chunk, :].astype(f32) * w_bc[0]
            for j in range(1, K):
                acc = acc + (xm_ref[0, base + j - PAD:base + j - PAD + chunk, :]
                             .astype(f32) * w_bc[j])
            o_ref[0, base:base + chunk, :] = acc.astype(out_dtype)

        if n_chunks > 1:
            boundary(t_tile - chunk)

        # ---- fix-up: global output rows T-1 and T if they fall inside an interior
        # chunk of this (last) tile -- only there could a direct read have touched
        # x rows >= T.  Recompute the 2 rows with explicit zeros and overwrite.
        if n_chunks > 2:
            r1 = (t_valid - 1) - t0              # tile-local row of global row T-1

            @pl.when((r1 >= chunk - 1) & (r1 <= t_tile - chunk - 1))
            def _():
                x_m3 = xm_ref[0, pl.ds(r1 - 2, 1), :].astype(f32)   # x[T-3]
                x_m2 = xm_ref[0, pl.ds(r1 - 1, 1), :].astype(f32)   # x[T-2]
                x_m1 = xm_ref[0, pl.ds(r1, 1), :].astype(f32)       # x[T-1]
                row_a = x_m3 * w_row[0] + x_m2 * w_row[1] + x_m1 * w_row[2]   # out[T-1]
                row_b = x_m2 * w_row[0] + x_m1 * w_row[1]                     # out[T]
                o_ref[0, pl.ds(r1, 1), :] = row_a.astype(out_dtype)
                o_ref[0, pl.ds(r1 + 1, 1), :] = row_b.astype(out_dtype)

    return kernel


def temporal_conv1d(x, weight):
    """x: (B, T, D); weight: (D, 1, K) PyTorch depthwise conv weight -> (B, T+1, D)."""
    B, T, D = x.shape
    K = weight.shape[-1]
    assert K == KERNEL_SIZE
    t_out = T + 2 * PAD - K + 1            # = T + 1
    dtype = x.dtype
    itemsize = jnp.dtype(dtype).itemsize

    # lane-dense channel padding; time only padded for degenerate tiny T (< 8).
    d_pad = _round_up(D, _LANE)
    if d_pad != D:
        x = jnp.pad(x, ((0, 0), (0, 0), (0, d_pad - D)))
    if T < _SUBLANE:
        x = jnp.pad(x, ((0, 0), (0, _SUBLANE - T), (0, 0)))
    t_in = x.shape[1]

    # weights stay in f32 (tiny); tap index on sublanes, channel on lanes.
    w_kd = jnp.transpose(weight[:, 0, :], (1, 0)).astype(jnp.float32)    # (K, D)
    w_kd = jnp.pad(w_kd, ((0, _SUBLANE - K), (0, d_pad - D)))            # (8, d_pad)

    # ---- tile selection -----------------------------------------------------------
    d_tile = next(dt for dt in (512, 384, 256, 128) if d_pad % dt == 0)
    n_d = d_pad // d_tile

    # Generation-aware time-tile budget: big tiles on 128 MiB-VMEM parts (v5e/v6e),
    # conservative 2 MiB/buffer on 64 MiB parts (v7x).
    try:
        vmem_cap = pltpu.get_tpu_info().vmem_capacity_bytes
    except Exception:
        vmem_cap = 64 * 1024 * 1024
    small_vmem = vmem_cap <= 64 * 1024 * 1024
    target_tile_bytes = (2 if small_vmem else 6) * 1024 * 1024

    t_cap = max(_SUBLANE, (t_in // _SUBLANE) * _SUBLANE)            # block <= array
    t_budget = max(_SUBLANE,
                   (target_tile_bytes // (d_tile * itemsize)) // _SUBLANE * _SUBLANE)
    t_tile_max = min(t_cap, t_budget, 2048)

    # Balance tiles so the trailing tile is not nearly empty (e.g. T % t_tile == 0).
    n_t = _cdiv(t_out, t_tile_max)
    t_tile = min(_round_up(_cdiv(t_out, n_t), _SUBLANE), t_tile_max)

    # chunk: keep the accumulator around 32 vregs; prefer t_tile a multiple of it.
    chunk_target = max(_SUBLANE, min(256, 32768 // d_tile))
    if t_tile_max >= chunk_target:
        t_bumped = _round_up(t_tile, chunk_target)
        if t_bumped <= t_tile_max:
            t_tile = t_bumped
    chunk = next(c for c in (256, 128, 64, 32, 16, 8)
                 if c <= chunk_target and t_tile % c == 0)
    n_chunks = t_tile // chunk
    n_t = _cdiv(t_out, t_tile)

    nb_main = _cdiv(t_in, t_tile)
    nb8 = _cdiv(t_in, _SUBLANE)
    r8 = t_tile // _SUBLANE

    # v7x megacore: lead with an even independent axis so both TensorCores get equal
    # work (B first by default; swap with the channel-tile axis if that helps).
    d_major = (B % 2 == 1) and (n_d % 2 == 0)
    grid = (n_d, B, n_t) if d_major else (B, n_d, n_t)

    def _bd(a0, a1):
        return (a1, a0) if d_major else (a0, a1)

    def xm_map(a0, a1, t):
        b, d = _bd(a0, a1)
        return (b, jnp.minimum(t, nb_main - 1), d)

    def xl_map(a0, a1, t):
        b, d = _bd(a0, a1)
        return (b, jnp.maximum(t * r8 - 1, 0), d)

    def xr_map(a0, a1, t):
        b, d = _bd(a0, a1)
        return (b, jnp.minimum((t + 1) * r8, nb8 - 1), d)

    def w_map(a0, a1, t):
        _, d = _bd(a0, a1)
        return (0, d)

    def o_map(a0, a1, t):
        b, d = _bd(a0, a1)
        return (b, t, d)

    xm_spec = pl.BlockSpec((1, t_tile, d_tile), xm_map)
    xl_spec = pl.BlockSpec((1, _SUBLANE, d_tile), xl_map)
    xr_spec = pl.BlockSpec((1, _SUBLANE, d_tile), xr_map)
    w_spec = pl.BlockSpec((_SUBLANE, d_tile), w_map)
    o_spec = pl.BlockSpec((1, t_tile, d_tile), o_map)

    # Output time extent is exactly T+1 (no wasted trailing tile, no wrapper time
    # slice); only bumped to t_tile for the degenerate tiny-T case.
    t_out_arr = max(t_out, t_tile)

    est = (2 * 2 * t_tile * d_tile * itemsize          # xm + o, double-buffered
           + 2 * 2 * _SUBLANE * d_tile * itemsize      # xl + xr, double-buffered
           + 2 * _SUBLANE * d_tile * 4                 # w (f32), double-buffered
           + (chunk + 2 * _HALO) * d_tile * itemsize)  # edge scratch
    vmem_limit = int(min(max(2 * est, 32 * 1024 * 1024),
                         48 * 1024 * 1024 if small_vmem else 100 * 1024 * 1024))

    kernel = _make_kernel(t_tile, chunk, d_tile, T, n_chunks)

    out = pl.pallas_call(
        kernel,
        out_shape=jax.ShapeDtypeStruct((B, t_out_arr, d_pad), dtype),
        grid_spec=pltpu.PrefetchScalarGridSpec(
            num_scalar_prefetch=0,
            grid=grid,
            in_specs=[xm_spec, xl_spec, xr_spec, w_spec],
            out_specs=o_spec,
            scratch_shapes=[pltpu.VMEM((chunk + 2 * _HALO, d_tile), dtype)],
        ),
        compiler_params=pltpu.CompilerParams(
            dimension_semantics=("parallel", "parallel", "parallel"),
            vmem_limit_bytes=vmem_limit,
        ),
    )(x, x, x, w_kd)

    if t_out_arr != t_out or d_pad != D:
        out = out[:, :t_out, :D]
    return out


def _reference(x, weight):
    """Numpy reference matching PyTorch F.conv1d (cross-correlation) semantics."""
    x = np.asarray(x).astype(np.float32)
    w = np.asarray(weight).astype(np.float32)     # (D, 1, K)
    B, T, D = x.shape
    K = w.shape[-1]
    pad = K // 2
    t_out = T + 2 * pad - K + 1
    xp = np.pad(x, ((0, 0), (pad, pad), (0, 0)))
    out = np.zeros((B, t_out, D), dtype=np.float32)
    for k in range(K):
        out += xp[:, k:k + t_out, :] * w[:, 0, k][None, None, :]
    return out


if __name__ == "__main__":
    key = jax.random.PRNGKey(0)
    ks = jax.random.split(key, 8)

    def check(x, w, rtol, atol):
        y = jax.block_until_ready(temporal_conv1d(x, w))
        B, T, D = x.shape
        assert y.shape == (B, T + 1, D), y.shape
        np.testing.assert_allclose(np.asarray(y).astype(np.float32),
                                   _reference(x, w), rtol=rtol, atol=atol)

    # 1) small shape implied by the module (B=2, T=8, D=32): single boundary chunk.
    x = jax.random.normal(ks[0], (2, 8, 32), dtype=jnp.float32)
    w = jax.random.normal(ks[1], (32, 1, KERNEL_SIZE), dtype=jnp.float32) * 0.1
    check(x, w, 1e-5, 1e-5)

    # 2) multiple channel tiles + two time tiles, T % 8 == 0, interior chunks,
    #    partial trailing input block, and the T-1/T fix-up path.
    x = jax.random.normal(ks[2], (2, 40, 1024), dtype=jnp.float32)
    w = jax.random.normal(ks[3], (1024, 1, KERNEL_SIZE), dtype=jnp.float32) * 0.1
    check(x, w, 1e-4, 1e-4)

    # 3) odd batch + even channel-tile grid (megacore-order swap), 64-row chunks,
    #    rows T-1/T landing in an interior chunk of the last tile (fix-up).
    x = jax.random.normal(ks[4], (1, 300, 1024), dtype=jnp.float32)
    w = jax.random.normal(ks[5], (1024, 1, KERNEL_SIZE), dtype=jnp.float32) * 0.1
    check(x, w, 1e-4, 1e-4)

    # 4) bf16 activations (f32 weights kept intact), T not a multiple of 8.
    x = jax.random.normal(ks[6], (2, 9, 32), dtype=jnp.float32).astype(jnp.bfloat16)
    w = jax.random.normal(ks[7], (32, 1, KERNEL_SIZE), dtype=jnp.float32) * 0.1
    check(x, w, 2.5e-2, 2.5e-2)

    print("KERNEL_OK")
</pallas_src>

<mosaic_0001>
module attributes {stable_mosaic.version = 11 : i64} {
  func.func @kernel(%arg0: i32, %arg1: i32, %arg2: i32, %arg3: memref<1x8x128xf32, #tpu.memory_space<vmem>>, %arg4: memref<1x8x128xf32, #tpu.memory_space<vmem>>, %arg5: memref<1x8x128xf32, #tpu.memory_space<vmem>>, %arg6: memref<8x128xf32, #tpu.memory_space<vmem>>, %arg7: memref<1x8x128xf32, #tpu.memory_space<vmem>>, %arg8: memref<24x128xf32, #tpu.memory_space<vmem>>) attributes {dimension_semantics = [#tpu.dimension_semantics<parallel>, #tpu.dimension_semantics<parallel>, #tpu.dimension_semantics<parallel>], iteration_bounds = array<i64: 2, 1, 2>, scalar_prefetch = 0 : i64, scratch_operands = 1 : i64, tpu.core_type = #tpu.core_type<tc>, window_params = [{transform_indices = @transform_0, window_bounds = array<i64: 1, 8, 128>}, {transform_indices = @transform_1, window_bounds = array<i64: 1, 8, 128>}, {transform_indices = @transform_2, window_bounds = array<i64: 1, 8, 128>}, {transform_indices = @transform_3, window_bounds = array<i64: 8, 128>}, {transform_indices = @transform_4, window_bounds = array<i64: 1, 8, 128>}]} {
    %c8_i32 = arith.constant 8 : i32
    %0 = arith.muli %arg2, %c8_i32 : i32
    %c0 = arith.constant 0 : index
    %c0_0 = arith.constant 0 : index
    %1 = vector.load %arg6[%c0, %c0_0] : memref<8x128xf32, #tpu.memory_space<vmem>>, vector<1x128xf32>
    %c1 = arith.constant 1 : index
    %c0_1 = arith.constant 0 : index
    %2 = vector.load %arg6[%c1, %c0_1] : memref<8x128xf32, #tpu.memory_space<vmem>>, vector<1x128xf32>
    %c2 = arith.constant 2 : index
    %c0_2 = arith.constant 0 : index
    %3 = vector.load %arg6[%c2, %c0_2] : memref<8x128xf32, #tpu.memory_space<vmem>>, vector<1x128xf32>
    %c3 = arith.constant 3 : index
    %c0_3 = arith.constant 0 : index
    %4 = vector.load %arg6[%c3, %c0_3] : memref<8x128xf32, #tpu.memory_space<vmem>>, vector<1x128xf32>
    %5 = vector.shape_cast %1 : vector<1x128xf32> to vector<1x128xf32>
    %6 = vector.broadcast %5 : vector<1x128xf32> to vector<8x128xf32>
    %7 = vector.shape_cast %2 : vector<1x128xf32> to vector<1x128xf32>
    %8 = vector.broadcast %7 : vector<1x128xf32> to vector<8x128xf32>
    %9 = vector.shape_cast %3 : vector<1x128xf32> to vector<1x128xf32>
    %10 = vector.broadcast %9 : vector<1x128xf32> to vector<8x128xf32>
    %11 = vector.shape_cast %4 : vector<1x128xf32> to vector<1x128xf32>
    %12 = vector.broadcast %11 : vector<1x128xf32> to vector<8x128xf32>
    %c0_i32 = arith.constant 0 : i32
    %13 = arith.addi %0, %c0_i32 : i32
    %c0_4 = arith.constant 0 : index
    %c0_5 = arith.constant 0 : index
    %c0_6 = arith.constant 0 : index
    %14 = vector.load %arg4[%c0_4, %c0_5, %c0_6] : memref<1x8x128xf32, #tpu.memory_space<vmem>>, vector<1x8x128xf32>
    %15 = vector.shape_cast %14 : vector<1x8x128xf32> to vector<8x128xf32>
    %16 = tpu.iota {dimensions = array<i32: 0>} : vector<8x1xi32>
    %c8_i32_7 = arith.constant 8 : i32
    %17 = arith.subi %13, %c8_i32_7 : i32
    %18 = vector.broadcast %17 : i32 to vector<8x1xi32>
    %19 = arith.addi %16, %18 : vector<8x1xi32>
    %c0_i32_8 = arith.constant 0 : i32
    %20 = vector.broadcast %c0_i32_8 : i32 to vector<8x1xi32>
    %21 = arith.cmpi sge, %19, %20 : vector<8x1xi32>
    %c8_i32_9 = arith.constant 8 : i32
    %22 = vector.broadcast %c8_i32_9 : i32 to vector<8x1xi32>
    %23 = arith.cmpi slt, %19, %22 : vector<8x1xi32>
    %24 = arith.andi %21, %23 : vector<8x1xi1>
    %c0_i32_10 = arith.constant 0 : i32
    %25 = arith.sitofp %c0_i32_10 : i32 to f32
    %26 = vector.shape_cast %24 : vector<8x1xi1> to vector<8x1xi1>
    %27 = vector.broadcast %26 : vector<8x1xi1> to vector<8x128xi1>
    %28 = vector.broadcast %25 : f32 to vector<8x128xf32>
    %29 = arith.select %27, %15, %28 : vector<8x128xi1>, vector<8x128xf32>
    %c0_11 = arith.constant 0 : index
    %c0_12 = arith.constant 0 : index
    %30 = vector.load %arg8[%c0_11, %c0_12] : memref<24x128xf32, #tpu.memory_space<vmem>>, vector<8x128xf32>
    tpu.vector_store %arg8[%c0_11, %c0_12], %29 {strides = array<i32>} : memref<24x128xf32, #tpu.memory_space<vmem>>, vector<8x128xf32>,
    %31 = tpu.iota {dimensions = array<i32: 0>} : vector<8x1xi32>
    %32 = vector.broadcast %13 : i32 to vector<8x1xi32>
    %33 = arith.addi %31, %32 : vector<8x1xi32>
    %c8_i32_13 = arith.constant 8 : i32
    %34 = vector.broadcast %c8_i32_13 : i32 to vector<8x1xi32>
    %35 = arith.cmpi slt, %33, %34 : vector<8x1xi32>
    %c0_14 = arith.constant 0 : index
    %c0_15 = arith.constant 0 : index
    %c0_16 = arith.constant 0 : index
    %36 = vector.load %arg3[%c0_14, %c0_15, %c0_16] : memref<1x8x128xf32, #tpu.memory_space<vmem>>, vector<1x8x128xf32>
    %37 = vector.shape_cast %36 : vector<1x8x128xf32> to vector<8x128xf32>
    %c0_i32_17 = arith.constant 0 : i32
    %38 = arith.sitofp %c0_i32_17 : i32 to f32
    %39 = vector.shape_cast %35 : vector<8x1xi1> to vector<8x1xi1>
    %40 = vector.broadcast %39 : vector<8x1xi1> to vector<8x128xi1>
    %41 = vector.broadcast %38 : f32 to vector<8x128xf32>
    %42 = arith.select %40, %37, %41 : vector<8x128xi1>, vector<8x128xf32>
    %c8 = arith.constant 8 : index
    %c0_18 = arith.constant 0 : index
    %43 = vector.load %arg8[%c8, %c0_18] : memref<24x128xf32, #tpu.memory_space<vmem>>, vector<8x128xf32>
    tpu.vector_store %arg8[%c8, %c0_18], %42 {strides = array<i32>} : memref<24x128xf32, #tpu.memory_space<vmem>>, vector<8x128xf32>,
    %c0_19 = arith.constant 0 : index
    %c0_20 = arith.constant 0 : index
    %c0_21 = arith.constant 0 : index
    %44 = vector.load %arg5[%c0_19, %c0_20, %c0_21] : memref<1x8x128xf32, #tpu.memory_space<vmem>>, vector<1x8x128xf32>
    %45 = vector.shape_cast %44 : vector<1x8x128xf32> to vector<8x128xf32>
    %46 = tpu.iota {dimensions = array<i32: 0>} : vector<8x1xi32>
    %c8_i32_22 = arith.constant 8 : i32
    %47 = arith.addi %13, %c8_i32_22 : i32
    %48 = vector.broadcast %47 : i32 to vector<8x1xi32>
    %49 = arith.addi %46, %48 : vector<8x1xi32>
    %c8_i32_23 = arith.constant 8 : i32
    %50 = vector.broadcast %c8_i32_23 : i32 to vector<8x1xi32>
    %51 = arith.cmpi slt, %49, %50 : vector<8x1xi32>
    %c0_i32_24 = arith.constant 0 : i32
    %52 = arith.sitofp %c0_i32_24 : i32 to f32
    %53 = vector.shape_cast %51 : vector<8x1xi1> to vector<8x1xi1>
    %54 = vector.broadcast %53 : vector<8x1xi1> to vector<8x128xi1>
    %55 = vector.broadcast %52 : f32 to vector<8x128xf32>
    %56 = arith.select %54, %45, %55 : vector<8x128xi1>, vector<8x128xf32>
    %c16 = arith.constant 16 : index
    %c0_25 = arith.constant 0 : index
    %57 = vector.load %arg8[%c16, %c0_25] : memref<24x128xf32, #tpu.memory_space<vmem>>, vector<8x128xf32>
    tpu.vector_store %arg8[%c16, %c0_25], %56 {strides = array<i32>} : memref<24x128xf32, #tpu.memory_space<vmem>>, vector<8x128xf32>,
    %c6 = arith.constant 6 : index
    %c0_26 = arith.constant 0 : index
    %58 = vector.load %arg8[%c6, %c0_26] : memref<24x128xf32, #tpu.memory_space<vmem>>, vector<8x128xf32>
    %59 = arith.mulf %58, %6 : vector<8x128xf32>
    %c7 = arith.constant 7 : index
    %c0_27 = arith.constant 0 : index
    %60 = vector.load %arg8[%c7, %c0_27] : memref<24x128xf32, #tpu.memory_space<vmem>>, vector<8x128xf32>
    %61 = arith.mulf %60, %8 : vector<8x128xf32>
    %62 = arith.addf %59, %61 : vector<8x128xf32>
    %c8_28 = arith.constant 8 : index
    %c0_29 = arith.constant 0 : index
    %63 = vector.load %arg8[%c8_28, %c0_29] : memref<24x128xf32, #tpu.memory_space<vmem>>, vector<8x128xf32>
    %64 = arith.mulf %63, %10 : vector<8x128xf32>
    %65 = arith.addf %62, %64 : vector<8x128xf32>
    %c9 = arith.constant 9 : index
    %c0_30 = arith.constant 0 : index
    %66 = vector.load %arg8[%c9, %c0_30] : memref<24x128xf32, #tpu.memory_space<vmem>>, vector<8x128xf32>
    %67 = arith.mulf %66, %12 : vector<8x128xf32>
    %68 = arith.addf %65, %67 : vector<8x128xf32>
    %c0_31 = arith.constant 0 : index
    %c0_32 = arith.constant 0 : index
    %c0_33 = arith.constant 0 : index
    %69 = vector.load %arg7[%c0_31, %c0_32, %c0_33] : memref<1x8x128xf32, #tpu.memory_space<vmem>>, vector<1x8x128xf32>
    %70 = vector.shape_cast %69 : vector<1x8x128xf32> to vector<8x128xf32>
    %71 = vector.shape_cast %68 : vector<8x128xf32> to vector<1x8x128xf32>
    tpu.vector_store %arg7[%c0_31, %c0_32, %c0_33], %71 {strides = array<i32>} : memref<1x8x128xf32, #tpu.memory_space<vmem>>, vector<1x8x128xf32>,
    return
  }
  func.func @transform_0(%arg0: i32, %arg1: i32, %arg2: i32) -> (i32, i32, i32) {
    %c0_i32 = arith.constant 0 : i32
    %0 = arith.minsi %arg2, %c0_i32 : i32
    %c0_i32_0 = arith.constant 0 : i32
    return %arg0, %0, %arg1 : i32, i32, i32
  }
  func.func @transform_1(%arg0: i32, %arg1: i32, %arg2: i32) -> (i32, i32, i32) {
    %c1_i32 = arith.constant 1 : i32
    %0 = arith.muli %arg2, %c1_i32 : i32
    %c1_i32_0 = arith.constant 1 : i32
    %1 = arith.subi %0, %c1_i32_0 : i32
    %c0_i32 = arith.constant 0 : i32
    %2 = arith.maxsi %1, %c0_i32 : i32
    %c0_i32_1 = arith.constant 0 : i32
    return %arg0, %2, %arg1 : i32, i32, i32
  }
  func.func @transform_2(%arg0: i32, %arg1: i32, %arg2: i32) -> (i32, i32, i32) {
    %c1_i32 = arith.constant 1 : i32
    %0 = arith.addi %arg2, %c1_i32 : i32
    %c1_i32_0 = arith.constant 1 : i32
    %1 = arith.muli %0, %c1_i32_0 : i32
    %c0_i32 = arith.constant 0 : i32
    %2 = arith.minsi %1, %c0_i32 : i32
    %c0_i32_1 = arith.constant 0 : i32
    return %arg0, %2, %arg1 : i32, i32, i32
  }
  func.func @transform_3(%arg0: i32, %arg1: i32, %arg2: i32) -> (i32, i32) {
    %c0_i32 = arith.constant 0 : i32
    %c0_i32_0 = arith.constant 0 : i32
    return %c0_i32, %arg1 : i32, i32
  }
  func.func @transform_4(%arg0: i32, %arg1: i32, %arg2: i32) -> (i32, i32, i32) {
    %c0_i32 = arith.constant 0 : i32
    return %arg0, %arg2, %arg1 : i32, i32, i32
  }
}

</mosaic_0001>

<bundles_post_ra>
// kernel: tpu_custom_call.1
= control target key start
LH: loop header
LB: loop body
LE: loop exit
PB: predicated region body
PF: predicated region fallthrough
CT: control target
= control target key end

     0   :  { %s1399_s0 = inlined_call_operand.hbm [shape: f32[2,8,128], index: 0, kind: input, shape index: {}]   ;;  %s1400_s1 = inlined_call_operand.hbm [shape: f32[2,8,128], index: 1, kind: input, shape index: {}]   ;;  %s1401_s2 = inlined_call_operand.hbm [shape: f32[2,8,128], index: 2, kind: input, shape index: {}]   ;;  %s1402_s3 = inlined_call_operand.vmem [shape: f32[8,128], index: 3, kind: input, shape index: {}]   ;;  %s1403_s4 = inlined_call_operand.vmem [shape: f32[2,9,128], index: 4, kind: output, shape index: {}]  }
   0x1   :  { %1415 = sst [smem:[#allocation17_spill]] %s1400_s1 }
   0x2   :  { %1416 = sst [smem:[#allocation18_spill]] %s1403_s4 }
   0x3   :  { %9 = vsyncpa [#allocation4], 0 }
   0x4   :  { %11 = vsyncpa [#allocation4 + $0x1], 0 }
   0x5   :  { %12 = vsyncpa [#allocation6], 0 }
   0x6   :  { %14 = vsyncpa [#allocation6 + $0x1], 0  ;;  %s1018_s15 = smov 0   ;;  %s1020_s16 = smov 0  }
   0x7   :  { %s1022_s17 = smov 0   ;;  %s1024_s18 = smov 0  }
   0x8   :  { %s1026_s19 = smov 0   ;;  %s1028_s20 = smov 0  }
   0x9   :  { %s1030_s21 = smov 0   ;;  %s1032_s22 = smov 0  }
   0xa   :  { %s1034_s23 = smov 0   ;;  %s1036_s24 = smov 0  }
   0xb   :  { %s1038_s25 = smov 0   ;;  %s1040_s26 = smov 0  }
   0xc   :  { %s1042_s27 = smov 0   ;;  %s1044_s28 = smov 0  }
   0xd LB: > { %1417 = sst [smem:[#allocation11_spill]] %s968_s23  ;;  %s1404_s29 = sadd.s32 4294967295, %s988_s28   ;;  %s988_s28 = sphi %s1044_s28, %s20_s28   ;;  %s984_s27 = sphi %s1042_s27, %s1453_s27   ;;  %s980_s26 = sphi %s1040_s26, %s1452_s26   ;;  %s976_s25 = sphi %s1038_s25, %s1451_s25   ;;  %s972_s24 = sphi %s1036_s24, %s1463_s24   ;;  %s968_s23 = sphi %s1034_s23, %s1449_s23   ;;  %s964_s22 = sphi %s1032_s22, %s1462_s22   ;;  %s960_s21 = sphi %s1030_s21, %s1461_s21   ;;  %s956_s20 = sphi %s1028_s20, %s1460_s20   ;;  %s952_s19 = sphi %s1026_s19, %s1459_s19   ;;  %s948_s18 = sphi %s1024_s18, %s1458_s18   ;;  %s944_s17 = sphi %s1022_s17, %s1457_s17   ;;  %s940_s16 = sphi %s1020_s16, %s1456_s16   ;;  %s936_s15 = sphi %s1018_s15, %s1455_s15  }
   0xe   : > { %1418 = sst [smem:[#allocation12_spill]] %s980_s26  ;;  %s32_s30 = sadd.s32 1, %s980_s26 }
   0xf   : > { %1419 = sst [smem:[#allocation13_spill]] %s984_s27  ;;  %p33_p0 = scmp.ge.s32.totalorder %s32_s30, 2 }
  0x10   : > { %s39_s5 = sadd.s32 1, %s984_s27  ;;  %p1409_p1 = scmp.eq.s32.totalorder %s988_s28, 0 }
  0x11   : > { %p1092_p2 = scmp.eq.s32.totalorder %s1404_s29, 0  ;;  %s1465_s30 = smov (%p33_p0, %s32_s30), 0 }
  0x12   : > { %1421 = sst [smem:[#allocation14_spill]] %s1465_s30  ;;  %s1467_s5 = smov (!%p33_p0, %s39_s5), %s984_s27 }
  0x13   : > { %p41_p3 = scmp.ge.s32.totalorder %s1467_s5, 2  ;;  %s90_s7 = sadd.s32 1, %s956_s20 }
  0x14   : > { %p97_p4 = scmp.ne.s32.totalorder %s956_s20, %s952_s19  ;;  %p103_p6 = scmp.ne.s32.totalorder %s952_s19, %s948_s18 }
  0x15   : > { %s1469_s5 = smov (%p41_p3, %s1467_s5), 0  ;;  %p1408_p9 = scmp.lt.s32.totalorder %s988_s28, 4 }
  0x16   : > { %1422 = sst [smem:[#allocation15_spill]] %s1469_s5  ;;  %s47_s8 = ssub.s32 %s984_s27, %s1469_s5 }
  0x17   : > { %p1108_p5 = por %p97_p4, %p1409_p1  ;;  %p1115_p7 = por %p103_p6, %p1092_p2 }
  0x18   : > { %p1119_p8 = scmp.eq.s32.totalorder %s47_s8, 0  ;;  %s248_s12 = sand.u32 1, %s988_s28  }
  0x19   : > { %s1424_s10 = scalar_select %p1115_p7, 1, 0 }
  0x1a   : > { %s1425_s11 = scalar_select %p1119_p8, 1, 0 }
  0x1b   : > { %s250_s13 = sand.u32 1, %s956_s20   ;;  %s1132_s5 = sshll.u32 %s984_s27, 7 }
  0x1c   : > { %s1129_s14 = scalar_select %p1119_p8, %s956_s20, %s90_s7  }
  0x1d   : > { %s629_s29 = sshll.u32 %s250_s13, 3  ;;  %s1426_s1 = sld [smem:[#allocation17_spill]] }
  0x1e   : > { %s252_s18 = scalar_lea.vmem [#allocation5], %s629_s29  ;;  %p1146_p10 = pnand %p1408_p9, %p1108_p5 }
  0x1f   : > { %s264_s30 = sshll.u32 %s252_s18, 4  ;;  %s1152_s29 = scalar_lea.sflag [#allocation6], %s248_s12  ;;  %s1140_s30 = int_to_ptr.vmem [resolvable:$true] %s264_s30 }
  0x20   : > { %p778_p0 = pneg %p1146_p10 }
  0x23   : > { %s1138_s8 = scalar_lea.hbm %s1426_s1, %s1132_s5  ;;  %s781_s13 = scalar_lea.hbm %s1426_s1, 256 }
  0x24   : > { %s776_s4 = scalar_lea.hbm %s1138_s8, 128  ;;  %p782_p5 = scmp.lt.u32.totalorder %s1138_s8, %s1426_s1 }
  0x25   : > { %p777_p13 = scmp.ne.s32.totalorder %s1138_s8, %s776_s4  ;;  %p783_p6 = scmp.lt.u32.totalorder %s781_s13, %s776_s4 }
  0x26   : > { %p785_p1 = scmp.lt.u32.totalorder %s776_s4, %s1138_s8 }
  0x27   : > { %p779_p3 = pnand %p778_p0, %p777_p13  ;;  %p784_p9 = por %p783_p6, %p782_p5 }
  0x29   : > { %p780_p4 = pneg %p779_p3  ;;  %p786_p11 = por %p785_p1, %p784_p9 }
  0x2b   : > { %p787_p12 = pnand %p786_p11, %p780_p4 }
  0x2d   : > { %790 = shalt.err (!%p787_p12)
}
  0x2e   : > { %s791_s12 = scalar_lea.vmem %s1140_s30, 128  ;;  %s990_s26 = smov [#allocation5]  }
  0x2f   : > { %p792_p13 = scmp.ne.s32.totalorder %s1140_s30, %s791_s12  ;;  %s796_s9 = sshll.u32 %s990_s26, 4  ;;  %s797_s9 = int_to_ptr.vmem [resolvable:$false] %s796_s9 }
  0x30   : > { %s798_s27 = scalar_lea.vmem %s797_s9, 256  ;;  %p799_p8 = scmp.lt.s32.totalorder %s1140_s30, %s797_s9 }
  0x31   : > { %p794_p3 = pnand %p792_p13, %p778_p0  ;;  %p800_p5 = scmp.lt.s32.totalorder %s798_s27, %s791_s12 }
  0x33   : > { %p795_p7 = pneg %p794_p3  ;;  %p801_p6 = por %p800_p5, %p799_p8 }
  0x35   : > { %p802_p1 = pnand %p801_p6, %p795_p7 }
  0x37   : > { %805 = shalt.err (!%p802_p1)
}
  0x38   : > { %659 = dma.hbm_to_vmem [thread:$0]  (!%p1146_p10), %s1138_s8, 128, %s1140_s30, %s1152_s29  }
  0x39   : > { %p1428_p7 = scmp.lt.s32.totalorder %s988_s28, 5  ;;  %p1429_p8 = scmp.ge.s32.totalorder %s988_s28, 1 }
  0x3a   : > { %s54_s4 = sadd.s32 1, %s968_s23  ;;  %p61_p11 = scmp.ne.s32.totalorder %s968_s23, %s964_s22 }
  0x3b   : > { %p1184_p9 = pnand %p1429_p8, %p1428_p7  ;;  %p67_p12 = scmp.ne.s32.totalorder %s964_s22, %s960_s21 }
  0x3c   : > { %s226_s13 = sand.u32 1, %s968_s23   ;;  %p1431_p0 = scmp.eq.s32.totalorder %s988_s28, 0 }
  0x3d   : > { %s1430_s7 = scalar_select %p1184_p9, 1, 0 }
  0x3e   : > { %p63_p4 = por %p1431_p0, %p61_p11  ;;  %p1198_p13 = por %p1092_p2, %p67_p12 }
  0x3f   : > { %s627_s12 = sshll.u32 %s226_s13, 3  ;;  %p1433_p3 = scmp.ne.s32.totalorder %s1425_s11, 0 }
  0x40   : > { %s1432_s18 = scalar_select %p1198_p13, 1, 0 }
  0x41   : > { %s1205_s30 = scalar_select %p1433_p3, %s968_s23, %s54_s4  }
  0x42   : > { %s230_s8 = scalar_lea.vmem [#allocation3], %s627_s12  ;;  %s1211_s1 = scalar_lea.hbm %s1399_s0, %s1132_s5 }
  0x43   : > { %1434 = sst [smem:[#allocation16_spill]] %s1205_s30  ;;  %s241_s26 = sshll.u32 %s230_s8, 4  ;;  %s1213_s26 = int_to_ptr.vmem [resolvable:$true] %s241_s26 }
  0x44   : > { %p1435_p10 = scmp.lt.s32.totalorder %s988_s28, 4  ;;  %s227_s4 = scalar_lea.sflag [#allocation4], %s226_s13 }
  0x45   : > { %s806_s12 = scalar_lea.hbm %s1211_s1, 128  ;;  %s811_s27 = scalar_lea.hbm %s1399_s0, 256 }
  0x46   : > { %p1217_p5 = pnand %p1435_p10, %p63_p4  ;;  %p807_p6 = scmp.ne.s32.totalorder %s1211_s1, %s806_s12 }
  0x47   : > { %p812_p11 = scmp.lt.u32.totalorder %s1211_s1, %s1399_s0  ;;  %p813_p12 = scmp.lt.u32.totalorder %s811_s27, %s806_s12 }
  0x48   : > { %p808_p1 = pneg %p1217_p5  ;;  %p815_p4 = scmp.lt.u32.totalorder %s806_s12, %s1211_s1 }
  0x49   : > { %p814_p0 = por %p813_p12, %p812_p11 }
  0x4a   : > { %p809_p7 = pnand %p808_p1, %p807_p6 }
  0x4b   : > { %p816_p10 = por %p815_p4, %p814_p0 }
  0x4c   : > { %p810_p8 = pneg %p809_p7 }
  0x4e   : > { %p817_p13 = pnand %p816_p10, %p810_p8 }
  0x50   : > { %820 = shalt.err (!%p817_p13)
}
  0x51   : > { %s821_s13 = scalar_lea.vmem %s1213_s26, 128  ;;  %s991_s8 = smov [#allocation3]  }
  0x52   : > { %p822_p6 = scmp.ne.s32.totalorder %s1213_s26, %s821_s13  ;;  %s826_s9 = sshll.u32 %s991_s8, 4  ;;  %s827_s9 = int_to_ptr.vmem [resolvable:$false] %s826_s9 }
  0x53   : > { %s828_s23 = scalar_lea.vmem %s827_s9, 256  ;;  %p829_p3 = scmp.lt.s32.totalorder %s1213_s26, %s827_s9 }
  0x54   : > { %p824_p7 = pnand %p822_p6, %p808_p1  ;;  %p830_p11 = scmp.lt.s32.totalorder %s828_s23, %s821_s13 }
  0x56   : > { %p825_p9 = pneg %p824_p7  ;;  %p831_p12 = por %p830_p11, %p829_p3 }
  0x58   : > { %p832_p0 = pnand %p831_p12, %p825_p9 }
  0x5a   : > { %835 = shalt.err (!%p832_p0)
}
  0x5b   : > { %656 = dma.hbm_to_vmem [thread:$0]  (!%p1217_p5), %s1211_s1, 128, %s1213_s26, %s227_s4  }
  0x5c   : > { %s126_s30 = sadd.s32 1, %s944_s17  ;;  %p133_p9 = scmp.ne.s32.totalorder %s944_s17, %s940_s16 }
  0x5d   : > { %p139_p13 = scmp.ne.s32.totalorder %s940_s16, %s936_s15  ;;  %s273_s12 = sand.u32 1, %s944_s17  }
  0x5e   : > { %p1437_p3 = scmp.eq.s32.totalorder %s988_s28, 0  ;;  %s632_s27 = sshll.u32 %s273_s12, 3 }
  0x5f   : > { %p1256_p8 = por %p139_p13, %p1092_p2  ;;  %p1439_p4 = scmp.ne.s32.totalorder %s1425_s11, 0 }
  0x60   : > { %p135_p1 = por %p133_p9, %p1437_p3  ;;  %s1269_s23 = scalar_lea.hbm %s1401_s2, %s1132_s5 }
  0x61   : > { %s1263_s13 = scalar_select %p1439_p4, %s944_s17, %s126_s30  }
  0x62   : > { %s275_s1 = scalar_lea.vmem [#allocation7], %s632_s27  ;;  %p1440_p2 = scmp.lt.s32.totalorder %s988_s28, 4 }
  0x63   : > { %s287_s15 = sshll.u32 %s275_s1, 4  ;;  %s836_s11 = scalar_lea.hbm %s1269_s23, 128  ;;  %s1271_s15 = int_to_ptr.vmem [resolvable:$true] %s287_s15 }
  0x64   : > { %p1275_p5 = pnand %p1440_p2, %p135_p1  ;;  %p837_p10 = scmp.ne.s32.totalorder %s1269_s23, %s836_s11 }
  0x65   : > { %s841_s4 = scalar_lea.hbm %s1401_s2, 256  ;;  %p842_p12 = scmp.lt.u32.totalorder %s1269_s23, %s1401_s2 }
  0x66   : > { %p838_p6 = pneg %p1275_p5  ;;  %p843_p0 = scmp.lt.u32.totalorder %s841_s4, %s836_s11 }
  0x67   : > { %p845_p13 = scmp.lt.u32.totalorder %s836_s11, %s1269_s23 }
  0x68   : > { %p839_p7 = pnand %p838_p6, %p837_p10  ;;  %p844_p9 = por %p843_p0, %p842_p12 }
  0x6a   : > { %p840_p11 = pneg %p839_p7  ;;  %p846_p3 = por %p845_p13, %p844_p9 }
  0x6c   : > { %p847_p1 = pnand %p846_p3, %p840_p11 }
  0x6e   : > { %850 = shalt.err (!%p847_p1)
}
  0x6f   : > { %s851_s27 = scalar_lea.vmem %s1271_s15, 128  ;;  %s992_s8 = smov [#allocation7]  }
  0x70   : > { %p852_p4 = scmp.ne.s32.totalorder %s1271_s15, %s851_s27  ;;  %s856_s9 = sshll.u32 %s992_s8, 4  ;;  %s857_s9 = int_to_ptr.vmem [resolvable:$false] %s856_s9 }
  0x71   : > { %s858_s1 = scalar_lea.vmem %s857_s9, 256  ;;  %p859_p7 = scmp.lt.s32.totalorder %s1271_s15, %s857_s9 }
  0x72   : > { %p854_p2 = pnand %p852_p4, %p838_p6  ;;  %p860_p12 = scmp.lt.s32.totalorder %s858_s1, %s851_s27 }
  0x74   : > { %p855_p10 = pneg %p854_p2  ;;  %p861_p0 = por %p860_p12, %p859_p7 }
  0x76   : > { %p862_p9 = pnand %p861_p0, %p855_p10 }
  0x78   : > { %865 = shalt.err (!%p862_p9)
}
  0x79   : > { %662 = dma.hbm_to_vmem [thread:$0]  (!%p1275_p5), %s1269_s23, 128, %s1271_s15, %s1152_s29  }
  0x7a   : > { %p1442_p11 = scmp.ne.s32.totalorder %s1430_s7, 0 }
  0x7b   : > { %s298_s11 = sand.u32 (!%p1442_p11), 1, %s964_s22   ;;  %p1443_p6 = scmp.ne.s32.totalorder (!%p1442_p11), %s1432_s18, 0 }
  0x7c   : > { %296 = sbr.rel (%p1442_p11) target bundleno = 169 (0xa9), region = 36  ;;  %s1308_s5 = sshll.u32 (!%p1442_p11), %s298_s11, 3 }
  0x7d   : > { %s299_s26 = scalar_lea.sflag (!%p1442_p11), [#allocation4], %s298_s11  ;;  %s302_s4 = scalar_lea.vmem (!%p1442_p11), [#allocation3], %s1308_s5 }
  0x83   : > { %923 = dma.done.wait (%p1443_p6), %s299_s26, 128  }
  0x84   : > { %925 = vsyncadd (%p1443_p6), %s299_s26, 4294967168  ;;  %s1444_s6 = sadd.s32 4294967295, %s988_s28   ;;  %s309_s7 = sand.u32 1, %s952_s19  }
  0x85   : > { %s307_s29 = sand.u32 1, %s1444_s6   ;;  %s636_s23 = sshll.u32 %s309_s7, 3 }
  0x86   : > { %s308_s15 = scalar_lea.sflag [#allocation6], %s307_s29  ;;  %s311_s30 = scalar_lea.vmem [#allocation5], %s636_s23 }
  0x87   : > { %p1445_p5 = scmp.ne.s32.totalorder %s1424_s10, 0 }
  0x89   : > { %927 = dma.done.wait (%p1445_p5), %s308_s15, 128  }
  0x8a   : > { %929 = vsyncadd (%p1445_p5), %s308_s15, 4294967168  ;;  %s318_s12 = sand.u32 1, %s940_s16  }
  0x8b   : > { %s637_s27 = sshll.u32 %s318_s12, 3 }
  0x8c   : > { %s320_s18 = scalar_lea.vmem [#allocation7], %s637_s27 }
  0x8d   : > { %931 = dma.done.wait (%p1256_p8), %s308_s15, 128  }
  0x8e   : > { %933 = vsyncadd (%p1256_p8), %s308_s15, 4294967168  ;;  %s640_s8 = sshll.u32 %s972_s24, 3  ;;  %v410_v0 = vlaneseq  ;;  %p377_p13 = scmp.lt.s32.totalorder %s976_s25, 1  ;;  %v409_v8 = vld [vmem:[%s311_s30] sm:$0xff]  ;;  %v425_v9 = vld [vmem:[%s302_s4] sm:$0xff] }
  0x8f   : > { %s412_s9 = sadd.s32 4294967288, %s640_s8  ;;  %v422_v1 = vstv %s640_s8  ;;  %s431_s1 = sadd.s32 8, %s640_s8  ;;  %v430_v12 = vld [vmem:[%s320_s18] sm:$0xff] }
  0x90   : > { %v411_v2 = vshrl.u32 %v410_v0, 7  ;;  %v413_v3 = vstv %s412_s9  ;;  %v432_v4 = vstv %s431_s1  ;;  %p379_p8 = scmp.lt.s32.totalorder %s972_s24, 1  ;;  %s1471_s25 = smov (!%p377_p13, %s976_s25), 1  ;;  %v641_v14 = vld [vmem:[%s1402_s3] ss:$0 sm:$0xff] }
  0x91   : > { %s638_s10 = sshll.u32 %s1471_s25, 1  ;;  %v642_v15 = vld [vmem:[%s1402_s3 + $0x1] ss:$0 sm:$0xff]  ;;  %v643_v16 = vld [vmem:[%s1402_s3 + $0x2] ss:$0 sm:$0xff]  ;;  %s1446_s12 = sld [smem:[#allocation18_spill]] }
  0x92   : > { %v414_v5 = vadd.s32 %v413_v3, %v411_v2  ;;  %v423_v6 = vadd.s32 %v422_v1, %v411_v2  ;;  %v433_v7 = vadd.s32 %v432_v4, %v411_v2  ;;  %s1473_s24 = smov (!%p379_p8, %s972_s24), 1  ;;  %v644_v22 = vld [vmem:[%s1402_s3 + $0x3] ss:$0 sm:$0xff] }
  0x93   : > { %s385_s29 = sadd.s32 %s638_s10, %s1473_s24 }
  0x94   : > { %vm415_vm0 = vcmp.ge.s32.totalorder %v414_v5, 0  ;;  %vm416_vm1 = vcmp.lt.s32.totalorder %v414_v5, 8  ;;  %vm424_vm2 = vcmp.lt.s32.totalorder %v423_v6, 8  ;;  %vm434_vm3 = vcmp.lt.s32.totalorder %v433_v7, 8  ;;  %s639_s23 = sshll.u32 %s385_s29, 3 }
  0x95   : > { %vm417_vm4 = vmand %vm415_vm0, %vm416_vm1  ;;  %v428_v11 = vsel %vm424_vm2, %v425_v9, 0.0  ;;  %v437_v13 = vsel %vm434_vm3, %v430_v12, 0.0 }
  0x96   : > { %v420_v10 = vsel %vm417_vm4, %v409_v8, 0.0  ;;  %429 = vst [vmem:[#allocation2 + $0x8] sm:$0xff] %v428_v11  ;;  %438 = vst [vmem:[#allocation2 + $0x10] sm:$0xff] %v437_v13  ;;  %v445_v21 = vmul.f32 %v643_v16, %v428_v11 }
  0x97   : > { %421 = vst [vmem:[#allocation2] sm:$0xff] %v420_v10  ;;  %s387_s27 = scalar_lea.vmem %s1446_s12, %s639_s23 }
  0x9d   : > { %v447_v23 = vld [vmem:[#allocation2 + $0x9] sm:$0xff] }
  0x9e   : > { %v439_v17 = vld [vmem:[#allocation2 + $0x6] sm:$0xff]  ;;  %v448_v26 = vmul.f32 %v644_v22, %v447_v23 }
  0x9f   : > { %v441_v18 = vld [vmem:[#allocation2 + $0x7] sm:$0xff]  ;;  %v440_v19 = vmul.f32 %v641_v14, %v439_v17 }
  0xa0   : > { %v442_v20 = vmul.f32 %v642_v15, %v441_v18 }
  0xa2   : > { %v443_v24 = vadd.f32 %v442_v20, %v440_v19 }
  0xa4   : > { %v446_v25 = vadd.f32 %v445_v21, %v443_v24 }
  0xa6   : > { %v449_v27 = vadd.f32 %v448_v26, %v446_v25 }
  0xa8   : > { %450 = vst [vmem:[%s387_s27] sm:$0xff] %v449_v27 }
  0xa9 PF: > { %s20_s28 = sadd.s32 1, %s988_s28   ;;  %s1448_s8 = sld [smem:[#allocation11_spill]] }
  0xaa   : > { %p1352_p3 = scmp.ge.s32.totalorder %s20_s28, 6   ;;  %s1449_s23 = sld [smem:[#allocation16_spill]] }
  0xab   : > { %s1450_s9 = sld [smem:[#allocation12_spill]]  ;;  %s1451_s25 = sld [smem:[#allocation13_spill]] }
  0xac   : > { %s1452_s26 = sld [smem:[#allocation14_spill]]  ;;  %s1453_s27 = sld [smem:[#allocation15_spill]] }
  0xad   : > { %s1455_s15 = smov %s940_s16  ;;  %s1456_s16 = smov %s944_s17 }
  0xae   : > { %s1457_s17 = smov %s1263_s13  ;;  %s1458_s18 = smov %s952_s19 }
  0xaf   : > { %s1459_s19 = smov %s956_s20  ;;  %s1460_s20 = smov %s1129_s14 }
  0xb0   : > { %s1461_s21 = smov %s964_s22  ;;  %s1462_s22 = smov %s1448_s8 }
  0xb1   : > { %s1463_s24 = smov %s1450_s9  ;;  %19 = sbr.rel (!%p1352_p3) target bundleno = 13 (0xd), region = 103 }
  0xb8   :  { %484 = vsyncpa [#allocation4], 1 }
  0xb9   :  { %486 = vsyncpa [#allocation4 + $0x1], 1 }
  0xba   :  { %487 = vsyncpa [#allocation6], 1 }
  0xbb   :  { %489 = vsyncpa [#allocation6 + $0x1], 1 }

</bundles_post_ra>
